<compile_context>
chip_gen: v7x
topology: tpu7x:2x2x1
jax: 0.10.0
libtpu: 0.0.40
codegen_flags: <defaults>
</compile_context>

<pallas_src>
import jax
import jax.numpy as jnp
from jax.experimental import pallas as pl
from jax.experimental.pallas import tpu as pltpu


# ---------------------------------------------------------------------------
# Per-generation VMEM budgets & tile sizing
# ---------------------------------------------------------------------------

_MAX_BATCH_TILE = 256


def _budgets():
    """(pipeline_budget_bytes, vmem_limit_bytes, keep_batch_steps_for_megacore)."""
    try:
        cap = pltpu.get_tpu_info().vmem_capacity_bytes
    except Exception:
        cap = 64 * 1024 * 1024  # conservative fallback
    if cap >= 128 * 1024 * 1024:
        # v5e / v6e: 128 MiB physical VMEM, single TensorCore -> big tiles.
        return 48 * 1024 * 1024, 96 * 1024 * 1024, False
    # v7x: 64 MiB physical VMEM, 2 TensorCores sharing HBM -> conservative tiles
    # and keep >= ~4 batch grid steps so megacore sharding has work for both TCs.
    return 16 * 1024 * 1024, 48 * 1024 * 1024, True


def _choose_tiles(B, S, H, n_hidden, n_out, itemsize, budget, keep_batch_steps):
    """Pick (batch_tile, hidden_tile) so double-buffered blocks fit the budget."""
    # Dtype-aware sublane multiple: 8 for f32, 16 for bf16, 32 for int8/fp8.
    sub = max(8, 32 // max(1, itemsize))

    def rows_for(ht):
        # Double-buffered: n_hidden hidden blocks + mask block + n_out output blocks.
        per_row = 2 * (n_hidden * S * ht + S + n_out * ht) * itemsize
        return max(1, budget // per_row)

    if H > 128:
        ht = (H // 128) * 128
        # Shrink the lane tile until one sublane group of batch rows fits the budget.
        while ht > 128 and rows_for(ht) < min(B, sub):
            ht = max(128, ((ht // 2) // 128) * 128)
    else:
        ht = H  # equals the full array dim -> no 128 constraint

    bt = min(B, _MAX_BATCH_TILE, rows_for(ht))
    if bt < B:
        # Round DOWN to a sublane multiple so we never overshoot the declared budget
        # (v7x fix); only round up to `sub` when the budget allows fewer than `sub`
        # rows — the vmem_limit keeps ~3x headroom over the pipeline budget.
        bt = max(min(B, sub), (bt // sub) * sub)

    if keep_batch_steps and B >= 4 * sub:
        bt = min(bt, max(sub, ((B // 4) // sub) * sub))
    return bt, ht


def _params(n_grid_axes, vmem_limit):
    return pltpu.CompilerParams(
        dimension_semantics=("parallel",) * n_grid_axes,
        vmem_limit_bytes=vmem_limit,
    )


# ---------------------------------------------------------------------------
# Kernels (each grid step processes Bt batch rows x Ht hidden lanes)
# ---------------------------------------------------------------------------

def _cls_kernel(h_ref, o_ref):
    # h_ref: (Bt, s_blk, Ht) with s_blk <= 8; o_ref: (Bt, 1, Ht). Single slab copy.
    o_ref[...] = h_ref[:, 0:1, :]


def _masked_avg_kernel(m_ref, h_ref, o_ref):
    # m_ref: (Bt, 1, S); h_ref: (Bt, S, Ht); o_ref: (Bt, 1, Ht)
    m = m_ref[...]
    num = jnp.einsum('bqs,bsh->bqh', m, h_ref[...],
                     preferred_element_type=jnp.float32)           # (Bt, 1, Ht)
    den = jnp.sum(m.astype(jnp.float32), axis=-1, keepdims=True)   # (Bt, 1, 1)
    o_ref[...] = (num * pl.reciprocal(den)).astype(o_ref.dtype)


def _masked_avg2_kernel(m_ref, h1_ref, h2_ref, o_ref):
    # ((h1 + h2) / 2 * mask).sum(seq) / mask.sum(seq): one VPU add + one batched dot.
    m = m_ref[...]
    h_sum = h1_ref[...] + h2_ref[...]
    num = jnp.einsum('bqs,bsh->bqh', m, h_sum, preferred_element_type=jnp.float32)
    den = jnp.sum(m.astype(jnp.float32), axis=-1, keepdims=True)
    o_ref[...] = (0.5 * num * pl.reciprocal(den)).astype(o_ref.dtype)


def _cls_avg_kernel(m_ref, h_ref, cls_ref, avg_ref):
    # Two (Bt, 1, Ht) full-block stores; concat happens outside the kernel.
    m = m_ref[...]
    h = h_ref[...]
    num = jnp.einsum('bqs,bsh->bqh', m, h, preferred_element_type=jnp.float32)
    den = jnp.sum(m.astype(jnp.float32), axis=-1, keepdims=True)
    avg_ref[...] = (num * pl.reciprocal(den)).astype(avg_ref.dtype)
    cls_ref[...] = h[:, 0:1, :].astype(cls_ref.dtype)


# ---------------------------------------------------------------------------
# pallas_call wrappers
# ---------------------------------------------------------------------------

def _cls_pool(last_hidden):
    B, S, H = last_hidden.shape
    s_blk = min(S, 8)                      # only DMA the first <=8 sequence rows
    budget, limit, keep_steps = _budgets()
    bt, ht = _choose_tiles(B, s_blk, H, n_hidden=1, n_out=1,
                           itemsize=last_hidden.dtype.itemsize,
                           budget=budget, keep_batch_steps=keep_steps)
    grid = (pl.cdiv(B, bt), pl.cdiv(H, ht))
    out = pl.pallas_call(
        _cls_kernel,
        out_shape=jax.ShapeDtypeStruct((B, 1, H), last_hidden.dtype),
        grid=grid,
        in_specs=[pl.BlockSpec((bt, s_blk, ht), lambda b, h: (b, 0, h))],
        out_specs=pl.BlockSpec((bt, 1, ht), lambda b, h: (b, 0, h)),
        compiler_params=_params(len(grid), limit),
    )(last_hidden)
    return out.reshape(B, H)


def _avg_pool(attention_mask, last_hidden):
    B, S, H = last_hidden.shape
    mask3 = attention_mask.astype(last_hidden.dtype).reshape(B, 1, S)
    budget, limit, keep_steps = _budgets()
    bt, ht = _choose_tiles(B, S, H, n_hidden=1, n_out=1,
                           itemsize=last_hidden.dtype.itemsize,
                           budget=budget, keep_batch_steps=keep_steps)
    grid = (pl.cdiv(B, bt), pl.cdiv(H, ht))
    out = pl.pallas_call(
        _masked_avg_kernel,
        out_shape=jax.ShapeDtypeStruct((B, 1, H), last_hidden.dtype),
        grid=grid,
        in_specs=[
            pl.BlockSpec((bt, 1, S), lambda b, h: (b, 0, 0)),
            pl.BlockSpec((bt, S, ht), lambda b, h: (b, 0, h)),
        ],
        out_specs=pl.BlockSpec((bt, 1, ht), lambda b, h: (b, 0, h)),
        compiler_params=_params(len(grid), limit),
    )(mask3, last_hidden)
    return out.reshape(B, H)


def _avg2_pool(attention_mask, h_a, h_b):
    B, S, H = h_a.shape
    mask3 = attention_mask.astype(h_a.dtype).reshape(B, 1, S)
    budget, limit, keep_steps = _budgets()
    bt, ht = _choose_tiles(B, S, H, n_hidden=2, n_out=1,
                           itemsize=h_a.dtype.itemsize,
                           budget=budget, keep_batch_steps=keep_steps)
    grid = (pl.cdiv(B, bt), pl.cdiv(H, ht))
    out = pl.pallas_call(
        _masked_avg2_kernel,
        out_shape=jax.ShapeDtypeStruct((B, 1, H), h_a.dtype),
        grid=grid,
        in_specs=[
            pl.BlockSpec((bt, 1, S), lambda b, h: (b, 0, 0)),
            pl.BlockSpec((bt, S, ht), lambda b, h: (b, 0, h)),
            pl.BlockSpec((bt, S, ht), lambda b, h: (b, 0, h)),
        ],
        out_specs=pl.BlockSpec((bt, 1, ht), lambda b, h: (b, 0, h)),
        compiler_params=_params(len(grid), limit),
    )(mask3, h_a, h_b)
    return out.reshape(B, H)


def _cls_avg_pool(attention_mask, last_hidden):
    B, S, H = last_hidden.shape
    mask3 = attention_mask.astype(last_hidden.dtype).reshape(B, 1, S)
    budget, limit, keep_steps = _budgets()
    bt, ht = _choose_tiles(B, S, H, n_hidden=1, n_out=2,
                           itemsize=last_hidden.dtype.itemsize,
                           budget=budget, keep_batch_steps=keep_steps)
    grid = (pl.cdiv(B, bt), pl.cdiv(H, ht))
    out_spec = pl.BlockSpec((bt, 1, ht), lambda b, h: (b, 0, h))
    cls_out, avg_out = pl.pallas_call(
        _cls_avg_kernel,
        out_shape=(jax.ShapeDtypeStruct((B, 1, H), last_hidden.dtype),
                   jax.ShapeDtypeStruct((B, 1, H), last_hidden.dtype)),
        grid=grid,
        in_specs=[
            pl.BlockSpec((bt, 1, S), lambda b, h: (b, 0, 0)),
            pl.BlockSpec((bt, S, ht), lambda b, h: (b, 0, h)),
        ],
        out_specs=(out_spec, out_spec),
        compiler_params=_params(len(grid), limit),
    )(mask3, last_hidden)
    # Concat in XLA: keeps both kernel stores full lane width regardless of H % 128.
    return jnp.concatenate([cls_out.reshape(B, H), avg_out.reshape(B, H)], axis=-1)


# ---------------------------------------------------------------------------
# Pooler module equivalent
# ---------------------------------------------------------------------------

class Pooler:
    """Parameter-free pooler matching simcse Pooler forward semantics."""

    VALID = ('cls', 'cls_avg', 'avg', 'cls_before_pooler', 'avg_top2',
             'avg_first_last')

    def __init__(self, pooler_type):
        assert pooler_type in self.VALID, 'unrecognized pooling type %s' % pooler_type
        self.pooler_type = pooler_type

    def __call__(self, attention_mask, last_hidden_state, pooler_output=None,
                 hidden_states=None):
        last_hidden = last_hidden_state
        if self.pooler_type in ('cls_before_pooler', 'cls'):
            return _cls_pool(last_hidden)
        elif self.pooler_type == 'avg':
            return _avg_pool(attention_mask, last_hidden)
        elif self.pooler_type == 'cls_avg':
            return _cls_avg_pool(attention_mask, last_hidden)
        elif self.pooler_type == 'avg_first_last':
            return _avg2_pool(attention_mask, hidden_states[0], hidden_states[-1])
        elif self.pooler_type == 'avg_top2':
            return _avg2_pool(attention_mask, hidden_states[-1], hidden_states[-2])
        else:
            raise NotImplementedError


# ---------------------------------------------------------------------------
# Pure-JAX reference (for correctness check)
# ---------------------------------------------------------------------------

def _reference(pooler_type, attention_mask, last_hidden, hidden_states):
    m = attention_mask.astype(last_hidden.dtype)
    if pooler_type in ('cls_before_pooler', 'cls'):
        return last_hidden[:, 0]
    if pooler_type == 'avg':
        return (last_hidden * m[:, :, None]).sum(1) / m.sum(-1)[:, None]
    if pooler_type == 'cls_avg':
        cls = last_hidden[:, 0]
        avg = (last_hidden * m[:, :, None]).sum(1) / m.sum(-1)[:, None]
        return jnp.concatenate([cls, avg], axis=-1)
    if pooler_type == 'avg_first_last':
        h = (hidden_states[0] + hidden_states[-1]) / 2.0
        return (h * m[:, :, None]).sum(1) / m.sum(-1)[:, None]
    if pooler_type == 'avg_top2':
        h = (hidden_states[-1] + hidden_states[-2]) / 2.0
        return (h * m[:, :, None]).sum(1) / m.sum(-1)[:, None]
    raise NotImplementedError


# ---------------------------------------------------------------------------
# Main
# ---------------------------------------------------------------------------

if __name__ == "__main__":
    B, S, H = 2, 8, 32
    n_layers = 3

    key = jax.random.PRNGKey(0)
    keys = jax.random.split(key, n_layers + 2)

    # hidden_states: tuple of layers, last element == last_hidden_state
    hidden_states = tuple(
        jax.random.normal(keys[i], (B, S, H), dtype=jnp.float32)
        for i in range(n_layers)
    )
    last_hidden = hidden_states[-1]
    pooler_output = jax.random.normal(keys[n_layers], (B, H), dtype=jnp.float32)

    # attention mask with some padding; all rows have at least one valid token
    # (all-zero rows would give den == 0 -> inf/NaN, same as the PyTorch reference).
    attention_mask = jnp.array(
        [[1, 1, 1, 1, 1, 1, 0, 0],
         [1, 1, 1, 1, 0, 0, 0, 0]], dtype=jnp.int32)

    ok = True
    for pooler_type in Pooler.VALID:
        pooler = Pooler(pooler_type)
        out = pooler(attention_mask, last_hidden, pooler_output, hidden_states)
        out = jax.block_until_ready(out)
        ref = _reference(pooler_type, attention_mask, last_hidden, hidden_states)
        if out.shape != ref.shape or not jnp.allclose(out, ref, atol=1e-5, rtol=1e-5):
            ok = False
            print(f"MISMATCH for pooler_type={pooler_type}")

    if ok:
        print("KERNEL_OK")
</pallas_src>

<mosaic_0001>
module attributes {stable_mosaic.version = 11 : i64} {
  func.func @_cls_kernel(%arg0: i32, %arg1: i32, %arg2: memref<2x8x32xf32, #tpu.memory_space<vmem>>, %arg3: memref<2x1x32xf32, #tpu.memory_space<vmem>>) attributes {dimension_semantics = [#tpu.dimension_semantics<parallel>, #tpu.dimension_semantics<parallel>], iteration_bounds = array<i64: 1, 1>, scalar_prefetch = 0 : i64, scratch_operands = 0 : i64, tpu.core_type = #tpu.core_type<tc>, window_params = [{transform_indices = @transform_0, window_bounds = array<i64: 2, 8, 32>}, {transform_indices = @transform_1, window_bounds = array<i64: 2, 1, 32>}]} {
    %c0 = arith.constant 0 : index
    %c0_0 = arith.constant 0 : index
    %c0_1 = arith.constant 0 : index
    %0 = vector.load %arg2[%c0, %c0_0, %c0_1] : memref<2x8x32xf32, #tpu.memory_space<vmem>>, vector<2x1x32xf32>
    %c0_2 = arith.constant 0 : index
    %c0_3 = arith.constant 0 : index
    %c0_4 = arith.constant 0 : index
    %1 = vector.load %arg3[%c0_2, %c0_3, %c0_4] : memref<2x1x32xf32, #tpu.memory_space<vmem>>, vector<2x1x32xf32>
    tpu.vector_store %arg3[%c0_2, %c0_3, %c0_4], %0 {strides = array<i32>} : memref<2x1x32xf32, #tpu.memory_space<vmem>>, vector<2x1x32xf32>,
    return
  }
  func.func @transform_0(%arg0: i32, %arg1: i32) -> (i32, i32, i32) {
    %c0_i32 = arith.constant 0 : i32
    %c0_i32_0 = arith.constant 0 : i32
    return %arg0, %c0_i32, %arg1 : i32, i32, i32
  }
  func.func @transform_1(%arg0: i32, %arg1: i32) -> (i32, i32, i32) {
    %c0_i32 = arith.constant 0 : i32
    %c0_i32_0 = arith.constant 0 : i32
    return %arg0, %c0_i32, %arg1 : i32, i32, i32
  }
}

</mosaic_0001>

<bundles_post_ra>
// kernel: tpu_custom_call.1
= control target key start
LH: loop header
LB: loop body
LE: loop exit
PB: predicated region body
PF: predicated region fallthrough
CT: control target
= control target key end

     0   :  { %6 = vsyncpa [#allocation3], 0  ;;  %s139_s0 = inlined_call_operand.hbm [shape: f32[2,8,32], index: 0, kind: input, shape index: {}]   ;;  %s140_s1 = inlined_call_operand.hbm [shape: f32[2,1,32], index: 1, kind: output, shape index: {}]  }
   0x1   :  { %7 = vsyncpa [#allocation4], 0  ;;  %s99_s6 = smov [#allocation2]   ;;  %s51_s10 = scalar_lea.hbm %s139_s0, 256 }
   0x2   :  { %s13_s7 = sshll.u32 %s99_s6, 4  ;;  %p52_p0 = scmp.ne.s32.totalorder %s139_s0, %s51_s10  ;;  %s14_s7 = int_to_ptr.vmem [resolvable:$true] %s13_s7 }
   0x3   :  { %p55_p1 = scmp.lt.u32.totalorder %s51_s10, %s139_s0 }
   0x5   :  { %p57_p2 = pnand %p55_p1, %p52_p0 }
   0x7   :  { %60 = shalt.err (!%p57_p2)
}
   0x8   :  { %s61_s15 = scalar_lea.vmem %s14_s7, 256  ;;  %p66_p4 = scmp.lt.s32.totalorder %s14_s7, %s14_s7 }
   0x9   :  { %p62_p3 = scmp.ne.s32.totalorder %s14_s7, %s61_s15  ;;  %p67_p5 = scmp.lt.s32.totalorder %s61_s15, %s61_s15 }
   0xb   :  { %p68_p6 = por %p67_p5, %p66_p4 }
   0xd   :  { %p69_p7 = pnand %p68_p6, %p62_p3 }
   0xf   :  { %72 = shalt.err (!%p69_p7)
}
  0x10   :  { %s100_s16 = smov 128   ;;  %s101_s17 = smov 8  }
  0x11   :  { %19 = dma.hbm_to_vmem [thread:$0]  %s139_s0, 256, %s14_s7, [#allocation3], %s100_s16, %s100_s16, %s101_s17  }
  0x12   :  { %95 = dma.done.wait [#allocation3], 256  }
  0x13   :  { %96 = vsyncadd [#allocation3], 4294967040  ;;  %s102_s20 = smov [#allocation5]   ;;  %vm25_vm0 = vcmask 253952   ;;  %v23_v0 = vld [vmem:[#allocation2] sm:$0x1] }
  0x14   :  { %s33_s21 = sshll.u32 %s102_s20, 4  ;;  %v24_v1 = vld [vmem:[#allocation2 + $0x8] sm:$0x1]  ;;  %26 = vst.msk [vmem:[#allocation5] sm:$0x1] %vm25_vm0, %v23_v0  ;;  %s34_s21 = int_to_ptr.vmem [resolvable:$true] %s33_s21 }
  0x15   :  { %27 = vst.msk [vmem:[#allocation5 + $0x1] sm:$0x1] %vm25_vm0, %v24_v1  ;;  %s73_s22 = scalar_lea.vmem %s34_s21, 32  ;;  %p78_p9 = scmp.lt.s32.totalorder %s34_s21, %s34_s21 }
  0x16   :  { %p74_p8 = scmp.ne.s32.totalorder %s34_s21, %s73_s22  ;;  %p79_p10 = scmp.lt.s32.totalorder %s73_s22, %s73_s22 }
  0x18   :  { %p80_p11 = por %p79_p10, %p78_p9 }
  0x1a   :  { %p81_p12 = pnand %p80_p11, %p74_p8 }
  0x1c   :  { %84 = shalt.err (!%p81_p12)
}
  0x1d   :  { %s85_s0 = scalar_lea.hbm %s140_s1, 32 }
  0x1e   :  { %p86_p13 = scmp.ne.s32.totalorder %s140_s1, %s85_s0  ;;  %p89_p0 = scmp.lt.u32.totalorder %s85_s0, %s140_s1 }
  0x20   :  { %p91_p1 = pnand %p89_p0, %p86_p13 }
  0x22   :  { %94 = shalt.err (!%p91_p1)
}
  0x23   :  { %s103_s29 = smov 16   ;;  %s104_s30 = smov 1  }
  0x24   :  { %39 = dma.vmem_to_hbm [thread:$0]  %s34_s21, 32, %s140_s1, [#allocation4], %s103_s29, %s103_s29, %s104_s30  }
  0x25   :  { %97 = dma.done.wait [#allocation4], 32  }
  0x26   :  { %98 = vsyncadd [#allocation4], 4294967264 }
  0x27   :  { %43 = vsyncpa [#allocation3], 1 }
  0x28   :  { %44 = vsyncpa [#allocation4], 1 }

</bundles_post_ra>
